<compile_context>
chip_gen: v6e
topology: v6e:2x2x1
jax: 0.10.0
libtpu: 0.0.40
codegen_flags: <defaults>
</compile_context>

<pallas_src>
import functools
import math

import jax
import jax.numpy as jnp
from jax.experimental import pallas as pl
from jax.experimental.pallas import tpu as pltpu

EPS = 1e-5       # module-level `eps` used in the recurrence
IN_EPS = 1e-5    # nn.InstanceNorm2d default eps


def _round_up(x, m):
    return ((x + m - 1) // m) * m


# --------------------------------------------------------------------------- #
# Stage 1: InstanceNorm2d(3) on a lane-dense (B*3, S) layout, row-block grid.
# --------------------------------------------------------------------------- #
def _instance_norm_kernel(x_ref, o_ref):
    x = x_ref[...].astype(jnp.float32)                           # (rt, S)
    mu = jnp.mean(x, axis=-1, keepdims=True)
    var = jnp.mean(jnp.square(x - mu), axis=-1, keepdims=True)   # biased var (PyTorch)
    o_ref[...] = ((x - mu) * jax.lax.rsqrt(var + IN_EPS)).astype(o_ref.dtype)


# --------------------------------------------------------------------------- #
# Stage 2: streamed xw = xf @ w1x  +  resident recurrence  +  fc2.
# --------------------------------------------------------------------------- #
def _recurrent_kernel(xf_ref, w1x_ref, b1_ref, w2_ref, b2_ref, w1h_hbm,
                      out_ref, xw_ref, w1h_vmem, w1h_sem,
                      *, n_rep, batch, n_neurons):
    k = pl.program_id(0)
    n_k = pl.num_programs(0)

    @pl.when(k == 0)
    def _():
        xw_ref[...] = jnp.zeros_like(xw_ref)
        # Single-buffered copy of the loop-invariant recurrence weight; it overlaps
        # with the entire K-streaming phase below.
        pltpu.make_async_copy(w1h_hbm, w1h_vmem, w1h_sem).start()

    # Loop-invariant contraction, K-tiled, f32-accumulated in VMEM scratch.
    xw_ref[...] += jnp.dot(xf_ref[...], w1x_ref[...],
                           preferred_element_type=jnp.float32)

    @pl.when(k == n_k - 1)
    def _():
        pltpu.make_async_copy(w1h_hbm, w1h_vmem, w1h_sem).wait()
        w1h = w1h_vmem[...]                            # (N, N), resident (1 buffer)
        xwb = xw_ref[...] + b1_ref[...]                # bias hoisted out of the loop
        numel = float(batch * n_neurons)
        inv_nn = 1.0 / float(n_neurons)

        def step(_, h):
            row_sum = jnp.sum(h, axis=1, keepdims=True)              # (B, 1)
            g_mean = jnp.sum(row_sum, keepdims=True) / numel         # (1, 1)
            d = h - g_mean                                           # two-pass variance
            g_var = jnp.sum(d * d, keepdims=True) / (numel - 1.0)    # unbiased (torch .std())
            inv_std = pl.reciprocal(EPS + jnp.sqrt(g_var), approx=True)   # EUP slot
            hn = (h - row_sum * inv_nn) * inv_std
            pre = xwb + jnp.dot(hn.astype(w1h.dtype), w1h,
                                preferred_element_type=jnp.float32)
            return jnp.maximum(pre, 0.0)

        h = jnp.ones((batch, n_neurons), jnp.float32)
        h = jax.lax.fori_loop(0, n_rep, step, h, unroll=(0 < n_rep <= 8))

        # fc2 on the VPU (lane reduce): avoids a 1-column MXU pass + drain.
        out_ref[...] = (jnp.sum(h * w2_ref[...], axis=-1, keepdims=True)
                        + b2_ref[0])


# --------------------------------------------------------------------------- #
# One-time weight preparation (pad / cast / layout).  Cache across forward calls.
# --------------------------------------------------------------------------- #
def prepare_params(params, *, compute_dtype=jnp.bfloat16, target_tile_bytes=1 << 20):
    w1x, w1h, b1, w2, b2 = params
    dx, n = w1x.shape
    assert w1h.shape == (n, n)
    itemsize = jnp.dtype(compute_dtype).itemsize

    # K tile sized so each streamed (k_tile, N) w1x tile DMA is ~target_tile_bytes
    # (>=0.5-1 MiB keeps the pipeline bandwidth-bound, not step-overhead bound),
    # clamped to [256, 4096] and to the padded K extent.
    kt = (target_tile_bytes // max(1, n * itemsize)) // 256 * 256
    kt = int(min(max(kt, 256), 4096, _round_up(dx, 256)))
    dx_pad = _round_up(dx, kt)

    w1x_p = jnp.zeros((dx_pad, n), compute_dtype).at[:dx, :].set(
        w1x.astype(compute_dtype))
    return dict(
        w1x=w1x_p,                                    # (Dx_pad, N), zero-padded rows
        w1h=w1h.astype(compute_dtype),                # (N, N), stays in HBM
        b1=b1.reshape(1, n).astype(jnp.float32),
        w2=w2.reshape(1, n).astype(jnp.float32),
        b2=b2.reshape(1).astype(jnp.float32),         # scalar -> SMEM
        dx=int(dx), dx_pad=int(dx_pad), k_tile=kt, n_neurons=int(n),
        compute_dtype=compute_dtype,
    )


# --------------------------------------------------------------------------- #
# Forward.
# --------------------------------------------------------------------------- #
def model_recurrent_forward(x_nchw, prep, *, n_rep):
    """x_nchw: (B, 3, H, W). Returns (B, 1) float32."""
    B, C, H, W = x_nchw.shape
    assert C == 3
    S = H * W
    dx, dx_pad, kt = prep["dx"], prep["dx_pad"], prep["k_tile"]
    N, cdt = prep["n_neurons"], prep["compute_dtype"]
    assert dx == 3 * S, "prepared params do not match this image size"
    assert B * N > 1

    # ---- Stage 1: InstanceNorm over (B*3, S) rows, emitting compute_dtype ----
    rows = B * C
    rt = max(8, min(1024, ((2 << 20) // (S * 4)) // 8 * 8))   # ~<=2 MiB f32 per block
    if rows <= rt:
        rt = rows
    x_rows = x_nchw.reshape(rows, S)
    xn_rows = pl.pallas_call(
        _instance_norm_kernel,
        out_shape=jax.ShapeDtypeStruct((rows, S), cdt),
        grid=(pl.cdiv(rows, rt),),
        in_specs=[pl.BlockSpec((rt, S), lambda r: (r, 0))],
        out_specs=pl.BlockSpec((rt, S), lambda r: (r, 0)),
        compiler_params=pltpu.CompilerParams(dimension_semantics=("parallel",)),
    )(x_rows)
    xf = xn_rows.reshape(B, dx)        # row-major == torch .view() channel-major flatten

    # Pad the activation only when Dx isn't K-tile aligned (im % 16 == 0 hits the
    # no-pad path).  Zero columns x zero weight rows contribute nothing.
    # TODO(synk): fold this pad into the instance-norm out_specs once S % 128 == 0.
    if dx_pad != dx:
        xf = jnp.zeros((B, dx_pad), cdt).at[:, :dx].set(xf)

    # ---- Stage 2: VMEM budget + main kernel ----
    itemsize = jnp.dtype(cdt).itemsize
    n_l = _round_up(N, 128)
    vmem_bytes = (
        2 * _round_up(B, 8) * kt * itemsize        # xf double-buffer
        + 2 * kt * n_l * itemsize                  # w1x double-buffer
        + _round_up(N, 16) * n_l * itemsize        # w1h resident scratch (single buffer)
        + _round_up(B, 8) * n_l * 4                # xw f32 accumulator
        + 4 * 8 * n_l * 4                          # b1 / w2 small blocks
        + 2 * 8 * 128 * 4                          # out block
    )
    vmem_limit = int(min(max(vmem_bytes + (8 << 20), 32 << 20), 128 << 20))

    kernel = functools.partial(_recurrent_kernel, n_rep=n_rep, batch=B, n_neurons=N)

    # TODO(synk): on v7x, shard the K-accumulation across the two TensorCores
    # (per-core partial xw + one cross-core add); the recurrence must stay on one core
    # because h.std() couples the whole batch each step.
    # TODO(synk): for very large n_neurons (module default 10000) w1h no longer fits
    # VMEM and the recurrence matmul needs its own streaming loop.
    out = pl.pallas_call(
        kernel,
        out_shape=jax.ShapeDtypeStruct((B, 1), jnp.float32),
        grid=(dx_pad // kt,),
        in_specs=[
            pl.BlockSpec((B, kt), lambda k: (0, k)),            # xf : streamed over K
            pl.BlockSpec((kt, N), lambda k: (k, 0)),            # w1x: streamed over K
            pl.BlockSpec((1, N), lambda k: (0, 0)),             # b1
            pl.BlockSpec((1, N), lambda k: (0, 0)),             # w2 (row vector)
            pl.BlockSpec(memory_space=pltpu.MemorySpace.SMEM),  # b2 scalar
            pl.BlockSpec(memory_space=pl.ANY),                  # w1h stays in HBM
        ],
        out_specs=pl.BlockSpec((B, 1), lambda k: (0, 0)),
        scratch_shapes=[
            pltpu.VMEM((B, N), jnp.float32),       # xw accumulator
            pltpu.VMEM((N, N), cdt),               # resident w1h (single-buffered)
            pltpu.SemaphoreType.DMA(()),           # w1h copy completion
        ],
        compiler_params=pltpu.CompilerParams(
            dimension_semantics=("arbitrary",),    # K is a reduction axis
            vmem_limit_bytes=vmem_limit),
    )(xf, prep["w1x"], prep["b1"], prep["w2"], prep["b2"], prep["w1h"])
    return out


# --------------------------------------------------------------------------- #
# Parameter init matching the PyTorch layer shapes (xavier, gain=0.1*relu_gain).
# --------------------------------------------------------------------------- #
def init_params(key, im_size, n_neurons):
    dx = 3 * im_size * im_size
    din1 = n_neurons + dx
    k1, k2 = jax.random.split(key)
    gain = 0.1 * math.sqrt(2.0)                       # 0.1 * calculate_gain('relu')

    bound1 = gain * math.sqrt(6.0 / (din1 + n_neurons))
    w1_t = jax.random.uniform(k1, (din1, n_neurons), jnp.float32, -bound1, bound1)
    w1x = w1_t[:dx, :]                                # (Dx, N) == fc1.weight[:, :Dx].T
    w1h = w1_t[dx:, :]                                # (N, N)  == fc1.weight[:, Dx:].T
    b1 = jnp.zeros((n_neurons,), jnp.float32)

    bound2 = gain * math.sqrt(6.0 / (n_neurons + 1))
    w2 = jax.random.uniform(k2, (1, n_neurons), jnp.float32, -bound2, bound2)
    b2 = jnp.zeros((1, 1), jnp.float32)
    return (w1x, w1h, b1, w2, b2)


# Pure-JAX f32 reference of the PyTorch forward (for a loose self-check).
def _reference_forward(x_nchw, params, *, n_rep):
    w1x, w1h, b1, w2, b2 = params
    B, C, H, W = x_nchw.shape
    S = H * W
    xr = x_nchw.reshape(B, C, S).astype(jnp.float32)
    mu = jnp.mean(xr, axis=-1, keepdims=True)
    var = jnp.mean(jnp.square(xr - mu), axis=-1, keepdims=True)
    xf = ((xr - mu) / jnp.sqrt(var + IN_EPS)).reshape(B, C * S)
    N = w1h.shape[0]
    h = jnp.ones((B, N), jnp.float32)
    for _ in range(n_rep):
        hn = (h - jnp.mean(h, axis=1, keepdims=True)) / (EPS + jnp.std(h, ddof=1))
        h = jax.nn.relu(xf @ w1x + hn @ w1h + b1.reshape(1, N))
    return h @ w2.T + b2.reshape(1, 1)


if __name__ == "__main__":
    # Small shapes consistent with the module (3 input channels).
    B, im_size, n_neurons, n_rep = 2, 8, 128, 4

    key = jax.random.PRNGKey(0)
    kx, kp = jax.random.split(key)
    x = jax.random.normal(kx, (B, 3, im_size, im_size), jnp.float32)
    params = init_params(kp, im_size, n_neurons)

    prep = prepare_params(params)          # one-time pad/cast; reuse across calls
    out = model_recurrent_forward(x, prep, n_rep=n_rep)
    out = jax.block_until_ready(out)

    assert out.shape == (B, 1)
    assert bool(jnp.all(jnp.isfinite(out)))
    ref = _reference_forward(x, params, n_rep=n_rep)
    max_err = float(jnp.max(jnp.abs(out - ref)))
    assert max_err < 5e-2, f"mismatch vs f32 reference: {max_err}"
    print("KERNEL_OK")
</pallas_src>

<mosaic_0001>
module attributes {stable_mosaic.version = 11 : i64} {
  func.func @_instance_norm_kernel(%arg0: i32, %arg1: memref<6x64xf32, #tpu.memory_space<vmem>>, %arg2: memref<6x64xbf16, #tpu.memory_space<vmem>>) attributes {dimension_semantics = [#tpu.dimension_semantics<parallel>], iteration_bounds = array<i64: 1>, scalar_prefetch = 0 : i64, scratch_operands = 0 : i64, tpu.core_type = #tpu.core_type<tc>, window_params = [{transform_indices = @transform_0, window_bounds = array<i64: 6, 64>}, {transform_indices = @transform_1, window_bounds = array<i64: 6, 64>}]} {
    %c0 = arith.constant 0 : index
    %c0_0 = arith.constant 0 : index
    %0 = vector.load %arg1[%c0, %c0_0] : memref<6x64xf32, #tpu.memory_space<vmem>>, vector<6x64xf32>
    %cst = arith.constant dense<0.000000e+00> : vector<6xf32>
    %1 = vector.multi_reduction <add>, %0, %cst [1] : vector<6x64xf32> to vector<6xf32>
    %2 = vector.shape_cast %1 : vector<6xf32> to vector<6x1xf32>
    %cst_1 = arith.constant 6.400000e+01 : f32
    %3 = vector.broadcast %cst_1 : f32 to vector<6x1xf32>
    %4 = arith.divf %2, %3 : vector<6x1xf32>
    %5 = vector.broadcast %4 : vector<6x1xf32> to vector<6x64xf32>
    %6 = arith.subf %0, %5 : vector<6x64xf32>
    %7 = arith.mulf %6, %6 : vector<6x64xf32>
    %cst_2 = arith.constant dense<0.000000e+00> : vector<6xf32>
    %8 = vector.multi_reduction <add>, %7, %cst_2 [1] : vector<6x64xf32> to vector<6xf32>
    %9 = vector.shape_cast %8 : vector<6xf32> to vector<6x1xf32>
    %cst_3 = arith.constant 6.400000e+01 : f32
    %10 = vector.broadcast %cst_3 : f32 to vector<6x1xf32>
    %11 = arith.divf %9, %10 : vector<6x1xf32>
    %12 = vector.broadcast %4 : vector<6x1xf32> to vector<6x64xf32>
    %13 = arith.subf %0, %12 : vector<6x64xf32>
    %cst_4 = arith.constant 9.99999974E-6 : f32
    %14 = vector.broadcast %cst_4 : f32 to vector<6x1xf32>
    %15 = arith.addf %11, %14 : vector<6x1xf32>
    %16 = math.rsqrt %15 : vector<6x1xf32>
    %17 = vector.broadcast %16 : vector<6x1xf32> to vector<6x64xf32>
    %18 = arith.mulf %13, %17 : vector<6x64xf32>
    %19 = arith.truncf %18 : vector<6x64xf32> to vector<6x64xbf16>
    %c0_5 = arith.constant 0 : index
    %c0_6 = arith.constant 0 : index
    %20 = vector.load %arg2[%c0_5, %c0_6] : memref<6x64xbf16, #tpu.memory_space<vmem>>, vector<6x64xbf16>
    tpu.vector_store %arg2[%c0_5, %c0_6], %19 {strides = array<i32>} : memref<6x64xbf16, #tpu.memory_space<vmem>>, vector<6x64xbf16>,
    return
  }
  func.func @transform_0(%arg0: i32) -> (i32, i32) {
    %c0_i32 = arith.constant 0 : i32
    %c0_i32_0 = arith.constant 0 : i32
    return %arg0, %c0_i32 : i32, i32
  }
  func.func @transform_1(%arg0: i32) -> (i32, i32) {
    %c0_i32 = arith.constant 0 : i32
    %c0_i32_0 = arith.constant 0 : i32
    return %arg0, %c0_i32 : i32, i32
  }
}

</mosaic_0001>

<bundles_post_ra>
// kernel: tpu_custom_call.1
= control target key start
LH: loop header
LB: loop body
LE: loop exit
PB: predicated region body
PF: predicated region fallthrough
CT: control target
= control target key end

     0   :  { %6 = vsyncpa [#allocation3], 0  ;;  %s121_s0 = inlined_call_operand.hbm [shape: f32[6,64], index: 0, kind: input, shape index: {}]   ;;  %s122_s1 = inlined_call_operand.hbm [shape: bf16[6,64], index: 1, kind: output, shape index: {}]  }
   0x1   :  { %7 = vsyncpa [#allocation4], 0  ;;  %s103_s6 = smov [#allocation2]  }
   0x2   :  { %s14_s7 = sshll.u32 %s103_s6, 4  ;;  %s15_s7 = int_to_ptr.vmem [resolvable:$true] %s14_s7 }
   0x3   :  { %s67_s8 = scalar_lea.vmem %s15_s7, 128  ;;  %p72_p1 = scmp.lt.s32.totalorder %s15_s7, %s15_s7 }
   0x4   :  { %p68_p0 = scmp.ne.s32.totalorder %s15_s7, %s67_s8  ;;  %p73_p2 = scmp.lt.s32.totalorder %s67_s8, %s67_s8 }
   0x6   :  { %p74_p3 = por %p73_p2, %p72_p1 }
   0x8   :  { %p75_p4 = pnand %p74_p3, %p68_p0 }
   0xa   :  { %78 = shalt.err (!%p75_p4)
}
   0xb   :  { %17 = dma.hbm_to_vmem [thread:$0]  %s121_s0, 128, %s15_s7, [#allocation3]  }
   0xc   :  { %99 = dma.done.wait [#allocation3], 128  }
   0xd   :  { %100 = vsyncadd [#allocation3], 4294967168  ;;  %vm22_vm0 = vcmask 521216   ;;  %v21_v0 = vld [vmem:[#allocation2] sm:$0x3f]  ;;  %s104_s11 = smov [#allocation5]  }
   0xe   :  { %v23_v1 = vsel %vm22_vm0, %v21_v0, 0.0  ;;  %s46_s12 = sshll.u32 %s104_s11, 4  ;;  %vm38_vm1 = vcmask 518144   ;;  %s47_s12 = int_to_ptr.vmem [resolvable:$true] %s46_s12 }
   0xf   :  { %24 = vadd.xlane.f32.xlu0 %v23_v1  ;;  %s79_s0 = scalar_lea.vmem %s47_s12, 64  ;;  %p84_p6 = scmp.lt.s32.totalorder %s47_s12, %s47_s12 }
  0x10   :  { %p80_p5 = scmp.ne.s32.totalorder %s47_s12, %s79_s0  ;;  %p85_p7 = scmp.lt.s32.totalorder %s79_s0, %s79_s0 }
  0x12   :  { %p86_p8 = por %p85_p7, %p84_p6 }
  0x14   :  { %p87_p9 = pnand %p86_p8, %p80_p5 }
  0x98   :  { %v25_v2 = vpop.xlane.xlu0 %24 }
  0x99   :  { %v27_v3 = vmul.f32 0.015625, %v25_v2 }
  0x9b   :  { %v28_v4 = vsub.f32 %v21_v0, %v27_v3 }
  0x9d   :  { %v29_v5 = vmul.f32 %v28_v4, %v28_v4 }
  0x9f   :  { %v30_v6 = vsel %vm22_vm0, %v29_v5, 0.0 }
  0xa0   :  { %31 = vadd.xlane.f32.xlu0 %v30_v6 }
 0x129   :  { %v32_v7 = vpop.xlane.xlu0 %31 }
 0x12a   :  { %v33_v8 = vmul.f32 0.015625, %v32_v7 }
 0x12c   :  { %v34_v9 = vadd.f32 1e-05, %v33_v8 }
 0x12e   :  { %57 = vrsqrt.f32 %v34_v9 }
 0x13b   :  { %v58_v10 = vpop.eup %57 }
 0x13c   :  { %v36_v11 = vmul.f32 %v58_v10, %v28_v4 }
 0x13e   :  { %v37_v12 = vpack.c.bf16 %v36_v11, %v36_v11 }
 0x140   :  { %39 = vst.msk [vmem:[#allocation5] sm:$0x7] %vm38_vm1, %v37_v12 }
 0x141   :  { %90 = shalt.err (!%p87_p9)
}
 0x142   :  { %49 = dma.vmem_to_hbm [thread:$0]  %s47_s12, 64, %s122_s1, [#allocation4]  }
 0x143   :  { %101 = dma.done.wait [#allocation4], 64  }
 0x144   :  { %102 = vsyncadd [#allocation4], 4294967232 }
 0x145   :  { %53 = vsyncpa [#allocation3], 1 }
 0x146   :  { %54 = vsyncpa [#allocation4], 1 }

</bundles_post_ra>
